<compile_context>
chip_gen: v7x
topology: tpu7x:2x2x1
jax: 0.10.0
libtpu: 0.0.40
codegen_flags: <defaults>
</compile_context>

<pallas_src>
import functools

import jax
import jax.numpy as jnp
from jax.experimental import pallas as pl
from jax.experimental.pallas import tpu as pltpu


def _round_up(x, m):
    return (x + m - 1) // m * m


def _eqlv2_kernel(cls_ref, label_ref, pos_grad_ref, neg_grad_ref, pos_neg_ref,
                  loss_ref, pos_out_ref, neg_out_ref, pn_out_ref,
                  *, gamma, mu, alpha, n_valid, tile_n):
    pid = pl.program_id(0)
    last = pl.num_programs(0) - 1

    # --- init accumulators (resident output blocks) on the first grid step ---
    @pl.when(pid == 0)
    def _():
        loss_ref[...] = jnp.zeros_like(loss_ref)
        pos_out_ref[...] = pos_grad_ref[...]
        neg_out_ref[...] = neg_grad_ref[...]

    x = cls_ref[...].astype(jnp.float32)          # (TILE_N, C) logits
    label = label_ref[...]                        # (TILE_N, 1) int32
    tn, n_c = x.shape

    # Mask rows past the true N (padding rows contribute nothing).
    row_ids = pid * tile_n + jax.lax.broadcasted_iota(jnp.int32, (tn, 1), 0)
    row_mask = (row_ids < n_valid).astype(jnp.float32)          # (TILE_N, 1)

    # target = one-hot(label) over classes (expand_label in the PyTorch code)
    class_ids = jax.lax.broadcasted_iota(jnp.int32, (tn, n_c), 1)
    target = (class_ids == label).astype(jnp.float32)           # (TILE_N, C)

    # get_weight(): neg_w = sigmoid(gamma*(pos_neg - mu)), pos_w = 1 + alpha*(1-neg_w)
    pos_neg = pos_neg_ref[...]                                  # (1, C)
    neg_w = 1.0 / (1.0 + jnp.exp(-gamma * (pos_neg - mu)))
    pos_w = 1.0 + alpha * (1.0 - neg_w)
    weight = (neg_w + (pos_w - neg_w) * target) * row_mask      # (TILE_N, C)

    # Stable BCE-with-logits and sigmoid sharing a single exp(-|x|).
    e = jnp.exp(-jnp.abs(x))
    bce = jnp.maximum(x, 0.0) - x * target + jnp.log1p(e)
    loss_ref[...] = loss_ref[...] + jnp.reshape(jnp.sum(bce * weight), (1, 1))

    inv1pe = 1.0 / (1.0 + e)
    prob = jnp.where(x >= 0.0, inv1pe, e * inv1pe)              # sigmoid(x)

    # collect_grad(): grad = |prob - target| for one-hot targets.
    gw = jnp.abs(prob - target) * weight
    pos_g = jnp.sum(gw * target, axis=0, keepdims=True)         # (1, C)
    neg_g = jnp.sum(gw, axis=0, keepdims=True) - pos_g          # (1, C)
    pos_out_ref[...] = pos_out_ref[...] + pos_g
    neg_out_ref[...] = neg_out_ref[...] + neg_g

    # --- finalize on the last grid step ---
    @pl.when(pid == last)
    def _():
        loss_ref[...] = loss_ref[...] / jnp.float32(n_valid)
        pn_out_ref[...] = pos_out_ref[...] / (neg_out_ref[...] + 1e-10)


def eqlv2_forward(cls_score, label, pos_grad, neg_grad, pos_neg,
                  gamma=12.0, mu=0.8, alpha=4.0, tile_n=None):
    """Returns (cls_loss, new_pos_grad, new_neg_grad, new_pos_neg)."""
    n_i, n_c = cls_score.shape
    if tile_n is None:
        # Biggest row tile that stays well under VMEM even on v7x (64 MiB).
        tile_n = min(1024, _round_up(n_i, 8))
    tile_n = _round_up(tile_n, 8)
    n_pad = _round_up(n_i, tile_n)
    num_tiles = n_pad // tile_n

    label2d = label.reshape(n_i, 1).astype(jnp.int32)
    if n_pad != n_i:
        # Pad rows are masked out inside the kernel.
        cls_score = jnp.pad(cls_score, ((0, n_pad - n_i), (0, 0)))
        label2d = jnp.pad(label2d, ((0, n_pad - n_i), (0, 0)))

    pos_grad = pos_grad.reshape(1, n_c).astype(jnp.float32)
    neg_grad = neg_grad.reshape(1, n_c).astype(jnp.float32)
    pos_neg = pos_neg.reshape(1, n_c).astype(jnp.float32)

    kernel = functools.partial(_eqlv2_kernel, gamma=gamma, mu=mu, alpha=alpha,
                               n_valid=n_i, tile_n=tile_n)

    itemsize = jnp.dtype(cls_score.dtype).itemsize
    cost = pl.CostEstimate(
        flops=15 * n_pad * n_c,
        transcendentals=2 * n_pad * n_c,
        bytes_accessed=n_pad * n_c * itemsize + n_pad * 4 + 7 * n_c * 4 + 4,
    )

    loss, new_pos, new_neg, new_pn = pl.pallas_call(
        kernel,
        out_shape=(
            jax.ShapeDtypeStruct((1, 1), jnp.float32),
            jax.ShapeDtypeStruct((1, n_c), jnp.float32),
            jax.ShapeDtypeStruct((1, n_c), jnp.float32),
            jax.ShapeDtypeStruct((1, n_c), jnp.float32),
        ),
        grid_spec=pltpu.PrefetchScalarGridSpec(
            num_scalar_prefetch=0,
            grid=(num_tiles,),
            in_specs=[
                pl.BlockSpec((tile_n, n_c), lambda i: (i, 0)),   # cls_score tile
                pl.BlockSpec((tile_n, 1), lambda i: (i, 0)),     # label tile
                pl.BlockSpec((1, n_c), lambda i: (0, 0)),        # pos_grad (full)
                pl.BlockSpec((1, n_c), lambda i: (0, 0)),        # neg_grad (full)
                pl.BlockSpec((1, n_c), lambda i: (0, 0)),        # pos_neg  (full)
            ],
            out_specs=(
                pl.BlockSpec((1, 1), lambda i: (0, 0)),          # loss accumulator
                pl.BlockSpec((1, n_c), lambda i: (0, 0)),        # new pos_grad
                pl.BlockSpec((1, n_c), lambda i: (0, 0)),        # new neg_grad
                pl.BlockSpec((1, n_c), lambda i: (0, 0)),        # new pos_neg
            ),
        ),
        compiler_params=pltpu.CompilerParams(
            dimension_semantics=("arbitrary",),   # N is a reduction axis
            vmem_limit_bytes=64 * 1024 * 1024,
        ),
        cost_estimate=cost,
    )(cls_score, label2d, pos_grad, neg_grad, pos_neg)

    return loss[0, 0], new_pos[0], new_neg[0], new_pn[0]


def _reference(cls_score, label, pos_grad, neg_grad, pos_neg,
               gamma=12.0, mu=0.8, alpha=4.0):
    n_i, n_c = cls_score.shape
    x = cls_score.astype(jnp.float32)
    target = jax.nn.one_hot(label, n_c, dtype=jnp.float32)
    neg_w = 1.0 / (1.0 + jnp.exp(-gamma * (pos_neg - mu)))
    pos_w = 1.0 + alpha * (1.0 - neg_w)
    weight = pos_w[None, :] * target + neg_w[None, :] * (1.0 - target)
    bce = (jnp.maximum(x, 0.0) - x * target + jnp.log1p(jnp.exp(-jnp.abs(x))))
    loss = jnp.sum(bce * weight) / n_i
    prob = jax.nn.sigmoid(x)
    grad = jnp.abs(target * (prob - 1.0) + (1.0 - target) * prob)
    new_pos = pos_grad + jnp.sum(grad * target * weight, axis=0)
    new_neg = neg_grad + jnp.sum(grad * (1.0 - target) * weight, axis=0)
    return loss, new_pos, new_neg, new_pos / (new_neg + 1e-10)


if __name__ == "__main__":
    num_classes = 18   # matches EQLv2 default __init__
    n_i = 20           # small batch of ROIs/samples (not a tile multiple)

    key = jax.random.PRNGKey(0)
    k1, k2 = jax.random.split(key)
    cls_score = jax.random.normal(k1, (n_i, num_classes), dtype=jnp.float32)
    label = jax.random.randint(k2, (n_i,), 0, num_classes, dtype=jnp.int32)

    # Buffers initialized exactly as in __init__
    pos_grad = jnp.zeros((num_classes,), jnp.float32)
    neg_grad = jnp.zeros((num_classes,), jnp.float32)
    pos_neg = jnp.ones((num_classes,), jnp.float32) * 100.0

    # tile_n=8 forces a multi-step grid even at this toy size so the
    # accumulate / mask / finalize paths are exercised.
    loss, npg, nng, npn = eqlv2_forward(cls_score, label, pos_grad, neg_grad,
                                        pos_neg, tile_n=8)
    jax.block_until_ready((loss, npg, nng, npn))

    ref_loss, ref_pg, ref_ng, ref_pn = _reference(cls_score, label,
                                                  pos_grad, neg_grad, pos_neg)
    assert jnp.allclose(loss, ref_loss, rtol=1e-5, atol=1e-5), (loss, ref_loss)
    assert jnp.allclose(npg, ref_pg, rtol=1e-5, atol=1e-5)
    assert jnp.allclose(nng, ref_ng, rtol=1e-5, atol=1e-5)
    assert jnp.allclose(npn, ref_pn, rtol=1e-4, atol=1e-5)

    print("KERNEL_OK")
</pallas_src>

<mosaic_0001>
module attributes {stable_mosaic.version = 11 : i64} {
  func.func @_eqlv2_kernel(%arg0: i32, %arg1: memref<8x18xf32, #tpu.memory_space<vmem>>, %arg2: memref<8x1xi32, #tpu.memory_space<vmem>>, %arg3: memref<1x18xf32, #tpu.memory_space<vmem>>, %arg4: memref<1x18xf32, #tpu.memory_space<vmem>>, %arg5: memref<1x18xf32, #tpu.memory_space<vmem>>, %arg6: memref<1x1xf32, #tpu.memory_space<vmem>>, %arg7: memref<1x18xf32, #tpu.memory_space<vmem>>, %arg8: memref<1x18xf32, #tpu.memory_space<vmem>>, %arg9: memref<1x18xf32, #tpu.memory_space<vmem>>) attributes {dimension_semantics = [#tpu.dimension_semantics<arbitrary>], iteration_bounds = array<i64: 3>, scalar_prefetch = 0 : i64, scratch_operands = 0 : i64, tpu.core_type = #tpu.core_type<tc>, window_params = [{transform_indices = @transform_0, window_bounds = array<i64: 8, 18>}, {transform_indices = @transform_1, window_bounds = array<i64: 8, 1>}, {pipeline_mode = #tpu.pipeline_mode<synchronous>, transform_indices = @transform_2, window_bounds = array<i64: 1, 18>}, {pipeline_mode = #tpu.pipeline_mode<synchronous>, transform_indices = @transform_3, window_bounds = array<i64: 1, 18>}, {pipeline_mode = #tpu.pipeline_mode<synchronous>, transform_indices = @transform_4, window_bounds = array<i64: 1, 18>}, {pipeline_mode = #tpu.pipeline_mode<synchronous>, transform_indices = @transform_5, window_bounds = array<i64: 1, 1>}, {pipeline_mode = #tpu.pipeline_mode<synchronous>, transform_indices = @transform_6, window_bounds = array<i64: 1, 18>}, {pipeline_mode = #tpu.pipeline_mode<synchronous>, transform_indices = @transform_7, window_bounds = array<i64: 1, 18>}, {pipeline_mode = #tpu.pipeline_mode<synchronous>, transform_indices = @transform_8, window_bounds = array<i64: 1, 18>}]} {
    %c0_i32 = arith.constant 0 : i32
    %0 = arith.cmpi eq, %arg0, %c0_i32 : i32
    %1 = arith.extui %0 : i1 to i32
    %c0_i32_0 = arith.constant 0 : i32
    %2 = arith.cmpi ne, %1, %c0_i32_0 : i32
    scf.if %2 {
      %cst_33 = arith.constant 0.000000e+00 : f32
      %86 = vector.broadcast %cst_33 : f32 to vector<1x1xf32>
      %c0_34 = arith.constant 0 : index
      %c0_35 = arith.constant 0 : index
      %87 = vector.load %arg6[%c0_34, %c0_35] : memref<1x1xf32, #tpu.memory_space<vmem>>, vector<1x1xf32>
      tpu.vector_store %arg6[%c0_34, %c0_35], %86 {strides = array<i32>} : memref<1x1xf32, #tpu.memory_space<vmem>>, vector<1x1xf32>,
      %c0_36 = arith.constant 0 : index
      %c0_37 = arith.constant 0 : index
      %88 = vector.load %arg3[%c0_36, %c0_37] : memref<1x18xf32, #tpu.memory_space<vmem>>, vector<1x18xf32>
      %c0_38 = arith.constant 0 : index
      %c0_39 = arith.constant 0 : index
      %89 = vector.load %arg7[%c0_38, %c0_39] : memref<1x18xf32, #tpu.memory_space<vmem>>, vector<1x18xf32>
      tpu.vector_store %arg7[%c0_38, %c0_39], %88 {strides = array<i32>} : memref<1x18xf32, #tpu.memory_space<vmem>>, vector<1x18xf32>,
      %c0_40 = arith.constant 0 : index
      %c0_41 = arith.constant 0 : index
      %90 = vector.load %arg4[%c0_40, %c0_41] : memref<1x18xf32, #tpu.memory_space<vmem>>, vector<1x18xf32>
      %c0_42 = arith.constant 0 : index
      %c0_43 = arith.constant 0 : index
      %91 = vector.load %arg8[%c0_42, %c0_43] : memref<1x18xf32, #tpu.memory_space<vmem>>, vector<1x18xf32>
      tpu.vector_store %arg8[%c0_42, %c0_43], %90 {strides = array<i32>} : memref<1x18xf32, #tpu.memory_space<vmem>>, vector<1x18xf32>,
    } else {
    }
    %c0 = arith.constant 0 : index
    %c0_1 = arith.constant 0 : index
    %3 = vector.load %arg1[%c0, %c0_1] : memref<8x18xf32, #tpu.memory_space<vmem>>, vector<8x18xf32>
    %c0_2 = arith.constant 0 : index
    %c0_3 = arith.constant 0 : index
    %4 = vector.load %arg2[%c0_2, %c0_3] : memref<8x1xi32, #tpu.memory_space<vmem>>, vector<8x1xi32>
    %c8_i32 = arith.constant 8 : i32
    %5 = arith.muli %arg0, %c8_i32 : i32
    %6 = tpu.iota {dimensions = array<i32: 0>} : vector<8x1xi32>
    %7 = vector.broadcast %5 : i32 to vector<8x1xi32>
    %8 = arith.addi %7, %6 : vector<8x1xi32>
    %c20_i32 = arith.constant 20 : i32
    %9 = vector.broadcast %c20_i32 : i32 to vector<8x1xi32>
    %10 = arith.cmpi slt, %8, %9 : vector<8x1xi32>
    %11 = arith.extui %10 : vector<8x1xi1> to vector<8x1xi32>
    %12 = arith.sitofp %11 : vector<8x1xi32> to vector<8x1xf32>
    %13 = tpu.iota {dimensions = array<i32: 1>} : vector<8x18xi32>
    %14 = vector.broadcast %4 : vector<8x1xi32> to vector<8x18xi32>
    %15 = arith.cmpi eq, %13, %14 : vector<8x18xi32>
    %16 = arith.extui %15 : vector<8x18xi1> to vector<8x18xi32>
    %17 = arith.sitofp %16 : vector<8x18xi32> to vector<8x18xf32>
    %c0_4 = arith.constant 0 : index
    %c0_5 = arith.constant 0 : index
    %18 = vector.load %arg5[%c0_4, %c0_5] : memref<1x18xf32, #tpu.memory_space<vmem>>, vector<1x18xf32>
    %cst = arith.constant 8.000000e-01 : f32
    %19 = vector.broadcast %cst : f32 to vector<1x18xf32>
    %20 = arith.subf %18, %19 : vector<1x18xf32>
    %cst_6 = arith.constant -1.200000e+01 : f32
    %21 = vector.broadcast %cst_6 : f32 to vector<1x18xf32>
    %22 = arith.mulf %21, %20 : vector<1x18xf32>
    %23 = math.exp %22 : vector<1x18xf32>
    %cst_7 = arith.constant 1.000000e+00 : f32
    %24 = vector.broadcast %cst_7 : f32 to vector<1x18xf32>
    %25 = arith.addf %24, %23 : vector<1x18xf32>
    %cst_8 = arith.constant 1.000000e+00 : f32
    %26 = vector.broadcast %cst_8 : f32 to vector<1x18xf32>
    %27 = arith.divf %26, %25 : vector<1x18xf32>
    %cst_9 = arith.constant 1.000000e+00 : f32
    %28 = vector.broadcast %cst_9 : f32 to vector<1x18xf32>
    %29 = arith.subf %28, %27 : vector<1x18xf32>
    %cst_10 = arith.constant 4.000000e+00 : f32
    %30 = vector.broadcast %cst_10 : f32 to vector<1x18xf32>
    %31 = arith.mulf %30, %29 : vector<1x18xf32>
    %cst_11 = arith.constant 1.000000e+00 : f32
    %32 = vector.broadcast %cst_11 : f32 to vector<1x18xf32>
    %33 = arith.addf %32, %31 : vector<1x18xf32>
    %34 = arith.subf %33, %27 : vector<1x18xf32>
    %35 = vector.broadcast %34 : vector<1x18xf32> to vector<8x18xf32>
    %36 = arith.mulf %35, %17 : vector<8x18xf32>
    %37 = vector.broadcast %27 : vector<1x18xf32> to vector<8x18xf32>
    %38 = arith.addf %37, %36 : vector<8x18xf32>
    %39 = vector.broadcast %12 : vector<8x1xf32> to vector<8x18xf32>
    %40 = arith.mulf %38, %39 : vector<8x18xf32>
    %41 = math.absf %3 : vector<8x18xf32>
    %cst_12 = arith.constant 0.000000e+00 : f32
    %42 = vector.broadcast %cst_12 : f32 to vector<8x18xf32>
    %43 = arith.subf %42, %41 : vector<8x18xf32>
    %44 = math.exp %43 : vector<8x18xf32>
    %cst_13 = arith.constant 0.000000e+00 : f32
    %45 = vector.broadcast %cst_13 : f32 to vector<8x18xf32>
    %46 = arith.maximumf %3, %45 : vector<8x18xf32>
    %47 = arith.mulf %3, %17 : vector<8x18xf32>
    %48 = arith.subf %46, %47 : vector<8x18xf32>
    %49 = math.log1p %44 : vector<8x18xf32>
    %50 = arith.addf %48, %49 : vector<8x18xf32>
    %c0_14 = arith.constant 0 : index
    %c0_15 = arith.constant 0 : index
    %51 = vector.load %arg6[%c0_14, %c0_15] : memref<1x1xf32, #tpu.memory_space<vmem>>, vector<1x1xf32>
    %52 = arith.mulf %50, %40 : vector<8x18xf32>
    %53 = vector.shape_cast %52 : vector<8x18xf32> to vector<1x8x18xf32>
    %cst_16 = arith.constant dense<0.000000e+00> : vector<1xf32>
    %54 = vector.multi_reduction <add>, %53, %cst_16 [1, 2] : vector<1x8x18xf32> to vector<1xf32>
    %55 = vector.shape_cast %54 : vector<1xf32> to vector<1x1x1xf32>
    %56 = vector.extract %55[0, 0, 0] : f32 from vector<1x1x1xf32>
    %57 = vector.broadcast %56 : f32 to vector<1x1xf32>
    %58 = arith.addf %51, %57 : vector<1x1xf32>
    %c0_17 = arith.constant 0 : index
    %c0_18 = arith.constant 0 : index
    %59 = vector.load %arg6[%c0_17, %c0_18] : memref<1x1xf32, #tpu.memory_space<vmem>>, vector<1x1xf32>
    tpu.vector_store %arg6[%c0_17, %c0_18], %58 {strides = array<i32>} : memref<1x1xf32, #tpu.memory_space<vmem>>, vector<1x1xf32>,
    %cst_19 = arith.constant 1.000000e+00 : f32
    %60 = vector.broadcast %cst_19 : f32 to vector<8x18xf32>
    %61 = arith.addf %60, %44 : vector<8x18xf32>
    %cst_20 = arith.constant 1.000000e+00 : f32
    %62 = vector.broadcast %cst_20 : f32 to vector<8x18xf32>
    %63 = arith.divf %62, %61 : vector<8x18xf32>
    %cst_21 = arith.constant 0.000000e+00 : f32
    %64 = vector.broadcast %cst_21 : f32 to vector<8x18xf32>
    %65 = arith.cmpf oge, %3, %64 : vector<8x18xf32>
    %66 = arith.mulf %44, %63 : vector<8x18xf32>
    %67 = arith.select %65, %63, %66 : vector<8x18xi1>, vector<8x18xf32>
    %68 = arith.subf %67, %17 : vector<8x18xf32>
    %69 = math.absf %68 : vector<8x18xf32>
    %70 = arith.mulf %69, %40 : vector<8x18xf32>
    %71 = arith.mulf %70, %17 : vector<8x18xf32>
    %cst_22 = arith.constant dense<0.000000e+00> : vector<18xf32>
    %72 = vector.multi_reduction <add>, %71, %cst_22 [0] : vector<8x18xf32> to vector<18xf32>
    %73 = vector.shape_cast %72 : vector<18xf32> to vector<1x18xf32>
    %cst_23 = arith.constant dense<0.000000e+00> : vector<18xf32>
    %74 = vector.multi_reduction <add>, %70, %cst_23 [0] : vector<8x18xf32> to vector<18xf32>
    %75 = vector.shape_cast %74 : vector<18xf32> to vector<1x18xf32>
    %76 = arith.subf %75, %73 : vector<1x18xf32>
    %c0_24 = arith.constant 0 : index
    %c0_25 = arith.constant 0 : index
    %77 = vector.load %arg7[%c0_24, %c0_25] : memref<1x18xf32, #tpu.memory_space<vmem>>, vector<1x18xf32>
    %78 = arith.addf %77, %73 : vector<1x18xf32>
    %c0_26 = arith.constant 0 : index
    %c0_27 = arith.constant 0 : index
    %79 = vector.load %arg7[%c0_26, %c0_27] : memref<1x18xf32, #tpu.memory_space<vmem>>, vector<1x18xf32>
    tpu.vector_store %arg7[%c0_26, %c0_27], %78 {strides = array<i32>} : memref<1x18xf32, #tpu.memory_space<vmem>>, vector<1x18xf32>,
    %c0_28 = arith.constant 0 : index
    %c0_29 = arith.constant 0 : index
    %80 = vector.load %arg8[%c0_28, %c0_29] : memref<1x18xf32, #tpu.memory_space<vmem>>, vector<1x18xf32>
    %81 = arith.addf %80, %76 : vector<1x18xf32>
    %c0_30 = arith.constant 0 : index
    %c0_31 = arith.constant 0 : index
    %82 = vector.load %arg8[%c0_30, %c0_31] : memref<1x18xf32, #tpu.memory_space<vmem>>, vector<1x18xf32>
    tpu.vector_store %arg8[%c0_30, %c0_31], %81 {strides = array<i32>} : memref<1x18xf32, #tpu.memory_space<vmem>>, vector<1x18xf32>,
    %c2_i32 = arith.constant 2 : i32
    %83 = arith.cmpi eq, %arg0, %c2_i32 : i32
    %84 = arith.extui %83 : i1 to i32
    %c0_i32_32 = arith.constant 0 : i32
    %85 = arith.cmpi ne, %84, %c0_i32_32 : i32
    scf.if %85 {
      %c0_33 = arith.constant 0 : index
      %c0_34 = arith.constant 0 : index
      %86 = vector.load %arg6[%c0_33, %c0_34] : memref<1x1xf32, #tpu.memory_space<vmem>>, vector<1x1xf32>
      %cst_35 = arith.constant 2.000000e+01 : f32
      %87 = vector.broadcast %cst_35 : f32 to vector<1x1xf32>
      %88 = arith.divf %86, %87 : vector<1x1xf32>
      %c0_36 = arith.constant 0 : index
      %c0_37 = arith.constant 0 : index
      %89 = vector.load %arg6[%c0_36, %c0_37] : memref<1x1xf32, #tpu.memory_space<vmem>>, vector<1x1xf32>
      tpu.vector_store %arg6[%c0_36, %c0_37], %88 {strides = array<i32>} : memref<1x1xf32, #tpu.memory_space<vmem>>, vector<1x1xf32>,
      %c0_38 = arith.constant 0 : index
      %c0_39 = arith.constant 0 : index
      %90 = vector.load %arg7[%c0_38, %c0_39] : memref<1x18xf32, #tpu.memory_space<vmem>>, vector<1x18xf32>
      %c0_40 = arith.constant 0 : index
      %c0_41 = arith.constant 0 : index
      %91 = vector.load %arg8[%c0_40, %c0_41] : memref<1x18xf32, #tpu.memory_space<vmem>>, vector<1x18xf32>
      %cst_42 = arith.constant 1.000000e-10 : f32
      %92 = vector.broadcast %cst_42 : f32 to vector<1x18xf32>
      %93 = arith.addf %91, %92 : vector<1x18xf32>
      %94 = arith.divf %90, %93 : vector<1x18xf32>
      %c0_43 = arith.constant 0 : index
      %c0_44 = arith.constant 0 : index
      %95 = vector.load %arg9[%c0_43, %c0_44] : memref<1x18xf32, #tpu.memory_space<vmem>>, vector<1x18xf32>
      tpu.vector_store %arg9[%c0_43, %c0_44], %94 {strides = array<i32>} : memref<1x18xf32, #tpu.memory_space<vmem>>, vector<1x18xf32>,
    } else {
    }
    return
  }
  func.func @transform_0(%arg0: i32) -> (i32, i32) {
    %c0_i32 = arith.constant 0 : i32
    %c0_i32_0 = arith.constant 0 : i32
    return %arg0, %c0_i32 : i32, i32
  }
  func.func @transform_1(%arg0: i32) -> (i32, i32) {
    %c0_i32 = arith.constant 0 : i32
    %c0_i32_0 = arith.constant 0 : i32
    return %arg0, %c0_i32 : i32, i32
  }
  func.func @transform_2(%arg0: i32) -> (i32, i32) {
    %c0_i32 = arith.constant 0 : i32
    %c0_i32_0 = arith.constant 0 : i32
    %c0_i32_1 = arith.constant 0 : i32
    return %c0_i32, %c0_i32_0 : i32, i32
  }
  func.func @transform_3(%arg0: i32) -> (i32, i32) {
    %c0_i32 = arith.constant 0 : i32
    %c0_i32_0 = arith.constant 0 : i32
    %c0_i32_1 = arith.constant 0 : i32
    return %c0_i32, %c0_i32_0 : i32, i32
  }
  func.func @transform_4(%arg0: i32) -> (i32, i32) {
    %c0_i32 = arith.constant 0 : i32
    %c0_i32_0 = arith.constant 0 : i32
    %c0_i32_1 = arith.constant 0 : i32
    return %c0_i32, %c0_i32_0 : i32, i32
  }
  func.func @transform_5(%arg0: i32) -> (i32, i32) {
    %c0_i32 = arith.constant 0 : i32
    %c0_i32_0 = arith.constant 0 : i32
    %c0_i32_1 = arith.constant 0 : i32
    return %c0_i32, %c0_i32_0 : i32, i32
  }
  func.func @transform_6(%arg0: i32) -> (i32, i32) {
    %c0_i32 = arith.constant 0 : i32
    %c0_i32_0 = arith.constant 0 : i32
    %c0_i32_1 = arith.constant 0 : i32
    return %c0_i32, %c0_i32_0 : i32, i32
  }
  func.func @transform_7(%arg0: i32) -> (i32, i32) {
    %c0_i32 = arith.constant 0 : i32
    %c0_i32_0 = arith.constant 0 : i32
    %c0_i32_1 = arith.constant 0 : i32
    return %c0_i32, %c0_i32_0 : i32, i32
  }
  func.func @transform_8(%arg0: i32) -> (i32, i32) {
    %c0_i32 = arith.constant 0 : i32
    %c0_i32_0 = arith.constant 0 : i32
    %c0_i32_1 = arith.constant 0 : i32
    return %c0_i32, %c0_i32_0 : i32, i32
  }
}

</mosaic_0001>

<bundles_post_ra>
// kernel: tpu_custom_call.1
= control target key start
LH: loop header
LB: loop body
LE: loop exit
PB: predicated region body
PF: predicated region fallthrough
CT: control target
= control target key end

     0   :  { %s1535_s0 = inlined_call_operand.hbm [shape: f32[24,18], index: 0, kind: input, shape index: {}]   ;;  %s1536_s1 = inlined_call_operand.hbm [shape: s32[24,1], index: 1, kind: input, shape index: {}]   ;;  %s1537_s2 = inlined_call_operand.hbm [shape: f32[1,18], index: 2, kind: input, shape index: {}]   ;;  %s1538_s3 = inlined_call_operand.hbm [shape: f32[1,18], index: 3, kind: input, shape index: {}]   ;;  %s1539_s4 = inlined_call_operand.hbm [shape: f32[1,18], index: 4, kind: input, shape index: {}]   ;;  %s1540_s5 = inlined_call_operand.hbm [shape: f32[1,1], index: 5, kind: output, shape index: {0}]   ;;  %s1541_s6 = inlined_call_operand.hbm [shape: f32[1,18], index: 6, kind: output, shape index: {1}]   ;;  %s1542_s7 = inlined_call_operand.hbm [shape: f32[1,18], index: 7, kind: output, shape index: {2}]   ;;  %s1543_s8 = inlined_call_operand.hbm [shape: f32[1,18], index: 8, kind: output, shape index: {3}]  }
   0x1   :  { %1547 = sst [smem:[#allocation24_spill]] %s1537_s2 }
   0x2   :  { %1548 = sst [smem:[#allocation25_spill]] %s1538_s3 }
   0x3   :  { %14 = vsyncpa [#allocation3], 0 }
   0x4   :  { %16 = vsyncpa [#allocation3 + $0x1], 0 }
   0x5   :  { %17 = vsyncpa [#allocation6], 0 }
   0x6   :  { %19 = vsyncpa [#allocation6 + $0x1], 0 }
   0x7   :  { %20 = vsyncpa [#allocation9], 0 }
   0x8   :  { %21 = vsyncpa [#allocation4], 0 }
   0x9   :  { %22 = vsyncpa [#allocation13], 0 }
   0xa   :  { %23 = vsyncpa [#allocation16], 0  ;;  %s1204_s27 = smov 0   ;;  %s1206_s28 = smov 0  }
   0xb   :  { %s1208_s29 = smov 0   ;;  %s1210_s30 = smov 0  }
   0xc LB: > { %s1223_s9 = sadd.s32 4294967295, %s1145_s30   ;;  %p49_p0 = scmp.ne.s32.totalorder %s1137_s28, %s1133_s27  ;;  %s1145_s30 = sphi %s1210_s30, %s1566_s30   ;;  %s1141_s29 = sphi %s1208_s29, %s1565_s29   ;;  %s1137_s28 = sphi %s1206_s28, %s1564_s28   ;;  %s1133_s27 = sphi %s1204_s27, %s1563_s27  }
   0xd   : > { %p1544_p1 = scmp.eq.s32.totalorder %s1223_s9, 0  ;;  %p687_p2 = scmp.ge.s32.totalorder %s1145_s30, 1 }
   0xe   : > { %p233_p3 = scmp.lt.s32.totalorder %s1145_s30, 4  ;;  %s1147_s12 = smov [#allocation7]  }
   0xf   : > { %p1232_p5 = por %p1544_p1, %p49_p0  ;;  %s246_s13 = sshll.u32 %s1147_s12, 4  ;;  %s247_s13 = int_to_ptr.vmem [resolvable:$true] %s246_s13 }
  0x10   : > { %p1236_p6 = pnand %p687_p2, %p233_p3  ;;  %s1148_s14 = smov [#allocation8]  }
  0x11   : > { %s1549_s10 = scalar_select %p1232_p5, 1, 0 }
  0x12   : > { %s1550_s11 = scalar_select %p1236_p6, 1, 0 }
  0x13   : > { %p752_p7 = pneg %p1236_p6  ;;  %s257_s15 = sshll.u32 %s1148_s14, 4  ;;  %s1248_s15 = int_to_ptr.vmem [resolvable:$true] %s257_s15 }
  0x14   : > { %s1149_s17 = smov [#allocation10]   ;;  %s1552_s2 = sld [smem:[#allocation24_spill]] }
  0x15   : > { %p1244_p8 = pnand %p752_p7, %p1544_p1  ;;  %s268_s18 = sshll.u32 %s1149_s17, 4  ;;  %s1250_s18 = int_to_ptr.vmem [resolvable:$true] %s268_s18 }
  0x17   : > { %p1260_p10 = pneg %p1244_p8 }
  0x1a   : > { %s839_s21 = scalar_lea.hbm %s1552_s2, 16 }
  0x1b   : > { %p840_p9 = scmp.ne.s32.totalorder %s1552_s2, %s839_s21  ;;  %p846_p13 = scmp.lt.u32.totalorder %s839_s21, %s1552_s2 }
  0x1d   : > { %p842_p11 = pnand %p1260_p10, %p840_p9 }
  0x1f   : > { %p843_p12 = pneg %p842_p11 }
  0x21   : > { %p848_p0 = pnand %p846_p13, %p843_p12 }
  0x23   : > { %851 = shalt.err (!%p848_p0)
}
  0x24   : > { %s852_s27 = scalar_lea.vmem %s247_s13, 16  ;;  %s859_s12 = scalar_lea.vmem %s247_s13, 32 }
  0x25   : > { %p853_p2 = scmp.ne.s32.totalorder %s247_s13, %s852_s27  ;;  %p860_p4 = scmp.lt.s32.totalorder %s247_s13, %s247_s13 }
  0x26   : > { %p861_p1 = scmp.lt.s32.totalorder %s859_s12, %s852_s27 }
  0x27   : > { %p855_p3 = pnand %p853_p2, %p1260_p10 }
  0x28   : > { %p862_p5 = por %p861_p1, %p860_p4 }
  0x29   : > { %p856_p7 = pneg %p855_p3 }
  0x2b   : > { %p863_p6 = pnand %p862_p5, %p856_p7 }
  0x2d   : > { %866 = shalt.err (!%p863_p6)
}
  0x2e   : > { %755 = dma.hbm_to_vmem [thread:$0]  (!%p1244_p8), %s1552_s2, 16, %s247_s13, [#allocation6]  }
  0x2f   : > { %s1554_s3 = sld [smem:[#allocation25_spill]] }
  0x35   : > { %s867_s21 = scalar_lea.hbm %s1554_s3, 16 }
  0x36   : > { %p868_p9 = scmp.ne.s32.totalorder %s1554_s3, %s867_s21  ;;  %p874_p4 = scmp.lt.u32.totalorder %s867_s21, %s1554_s3 }
  0x38   : > { %p870_p11 = pnand %p868_p9, %p1260_p10 }
  0x3a   : > { %p871_p1 = pneg %p870_p11 }
  0x3c   : > { %p876_p5 = pnand %p874_p4, %p871_p1 }
  0x3e   : > { %879 = shalt.err (!%p876_p5)
}
  0x3f   : > { %s880_s13 = scalar_lea.vmem %s1248_s15, 16  ;;  %s887_s27 = scalar_lea.vmem %s1248_s15, 32 }
  0x40   : > { %p881_p6 = scmp.ne.s32.totalorder %s1248_s15, %s880_s13  ;;  %p888_p0 = scmp.lt.s32.totalorder %s1248_s15, %s1248_s15 }
  0x41   : > { %p889_p2 = scmp.lt.s32.totalorder %s887_s27, %s880_s13 }
  0x42   : > { %p883_p12 = pnand %p881_p6, %p1260_p10 }
  0x43   : > { %p890_p3 = por %p889_p2, %p888_p0 }
  0x44   : > { %p884_p13 = pneg %p883_p12 }
  0x46   : > { %p891_p7 = pnand %p890_p3, %p884_p13 }
  0x48   : > { %894 = shalt.err (!%p891_p7)
}
  0x49   : > { %758 = dma.hbm_to_vmem [thread:$0]  (!%p1244_p8), %s1554_s3, 16, %s1248_s15, [#allocation9]  }
  0x4a   : > { %s895_s20 = scalar_lea.hbm %s1539_s4, 16 }
  0x4b   : > { %p896_p9 = scmp.ne.s32.totalorder %s1539_s4, %s895_s20  ;;  %p902_p4 = scmp.lt.u32.totalorder %s895_s20, %s1539_s4 }
  0x4d   : > { %p898_p11 = pnand %p896_p9, %p1260_p10 }
  0x4f   : > { %p899_p1 = pneg %p898_p11 }
  0x51   : > { %p904_p5 = pnand %p902_p4, %p899_p1 }
  0x53   : > { %907 = shalt.err (!%p904_p5)
}
  0x54   : > { %s908_s15 = scalar_lea.vmem %s1250_s18, 16  ;;  %s915_s26 = scalar_lea.vmem %s1250_s18, 32 }
  0x55   : > { %p909_p6 = scmp.ne.s32.totalorder %s1250_s18, %s908_s15  ;;  %p916_p0 = scmp.lt.s32.totalorder %s1250_s18, %s1250_s18 }
  0x56   : > { %p917_p2 = scmp.lt.s32.totalorder %s915_s26, %s908_s15 }
  0x57   : > { %p911_p12 = pnand %p909_p6, %p1260_p10 }
  0x58   : > { %p918_p3 = por %p917_p2, %p916_p0 }
  0x59   : > { %p912_p13 = pneg %p911_p12 }
  0x5b   : > { %p919_p7 = pnand %p918_p3, %p912_p13 }
  0x5d   : > { %922 = shalt.err (!%p919_p7)
}
  0x5e   : > { %761 = dma.hbm_to_vmem [thread:$0]  (!%p1244_p8), %s1539_s4, 16, %s1250_s18, [#allocation9]  }
  0x5f   : > { %s1325_s24 = sadd.s32 1, %s1145_s30   ;;  %s36_s16 = sadd.s32 1, %s1141_s29 }
  0x60   : > { %s33_s12 = ssub.s32 %s1145_s30, %s1325_s24  ;;  %p43_p9 = scmp.ne.s32.totalorder %s1141_s29, %s1137_s28 }
  0x61   : > { %p34_p10 = scmp.eq.s32.totalorder %s33_s12, 0  ;;  %p44_p11 = scmp.eq.s32.totalorder %s1145_s30, 0 }
  0x62   : > { %p772_p1 = scmp.lt.s32.totalorder %s1145_s30, 3  ;;  %s279_s17 = sand.u32 1, %s1141_s29  }
  0x63   : > { %s1335_s14 = scalar_select %p34_p10, %s1141_s29, %s36_s16  }
  0x64   : > { %p45_p4 = por %p44_p11, %p43_p9  ;;  %s1338_s19 = sshll.u32 %s279_s17, 3 }
  0x65   : > { %s693_s20 = sshll.u32 %s1145_s30, 7  ;;  %s283_s23 = scalar_lea.vmem [#allocation2], %s1338_s19 }
  0x66   : > { %s1344_s22 = scalar_lea.hbm %s1535_s0, %s693_s20  ;;  %s290_s25 = sshll.u32 %s283_s23, 4  ;;  %s1347_s25 = int_to_ptr.vmem [resolvable:$true] %s290_s25 }
  0x67   : > { %p1349_p8 = pnand %p772_p1, %p45_p4  ;;  %s1356_s27 = scalar_lea.hbm %s1536_s1, %s693_s20 }
  0x68   : > { %s297_s12 = sand.u32 1, %s1145_s30   ;;  %s280_s16 = scalar_lea.sflag [#allocation3], %s279_s17 }
  0x69   : > { %s923_s21 = scalar_lea.hbm %s1344_s22, 128  ;;  %p925_p6 = pneg %p1349_p8 }
  0x6a   : > { %p924_p5 = scmp.ne.s32.totalorder %s1344_s22, %s923_s21  ;;  %s928_s2 = scalar_lea.hbm %s1535_s0, 384 }
  0x6b   : > { %p929_p0 = scmp.lt.u32.totalorder %s1344_s22, %s1535_s0  ;;  %p930_p2 = scmp.lt.u32.totalorder %s928_s2, %s923_s21 }
  0x6c   : > { %p926_p12 = pnand %p925_p6, %p924_p5  ;;  %p932_p7 = scmp.lt.u32.totalorder %s923_s21, %s1344_s22 }
  0x6d   : > { %p931_p3 = por %p930_p2, %p929_p0 }
  0x6e   : > { %p927_p13 = pneg %p926_p12 }
  0x6f   : > { %p933_p10 = por %p932_p7, %p931_p3 }
  0x71   : > { %p934_p9 = pnand %p933_p10, %p927_p13 }
  0x73   : > { %937 = shalt.err (!%p934_p9)
}
  0x74   : > { %s938_s17 = scalar_lea.vmem %s1347_s25, 128  ;;  %s1150_s20 = smov [#allocation2]  }
  0x75   : > { %p939_p11 = scmp.ne.s32.totalorder %s1347_s25, %s938_s17  ;;  %s943_s13 = sshll.u32 %s1150_s20, 4  ;;  %s944_s13 = int_to_ptr.vmem [resolvable:$false] %s943_s13 }
  0x76   : > { %s945_s3 = scalar_lea.vmem %s944_s13, 256  ;;  %p946_p5 = scmp.lt.s32.totalorder %s1347_s25, %s944_s13 }
  0x77   : > { %p941_p1 = pnand %p939_p11, %p925_p6  ;;  %p947_p12 = scmp.lt.s32.totalorder %s945_s3, %s938_s17 }
  0x79   : > { %p942_p4 = pneg %p941_p1  ;;  %p948_p0 = por %p947_p12, %p946_p5 }
  0x7b   : > { %p949_p2 = pnand %p948_p0, %p942_p4 }
  0x7d   : > { %952 = shalt.err (!%p949_p2)
}
  0x7e   : > { %765 = dma.hbm_to_vmem [thread:$0]  (!%p1349_p8), %s1344_s22, 128, %s1347_s25, %s280_s16  }
  0x7f   : > { %s301_s2 = scalar_lea.vmem [#allocation5], %s1338_s19  ;;  %s298_s18 = scalar_lea.sflag [#allocation6], %s297_s12 }
  0x80   : > { %s308_s21 = sshll.u32 %s301_s2, 4  ;;  %s953_s23 = scalar_lea.hbm %s1356_s27, 128  ;;  %s309_s21 = int_to_ptr.vmem [resolvable:$true] %s308_s21 }
  0x81   : > { %p954_p13 = scmp.ne.s32.totalorder %s1356_s27, %s953_s23  ;;  %s958_s20 = scalar_lea.hbm %s1536_s1, 384 }
  0x82   : > { %p959_p10 = scmp.lt.u32.totalorder %s1356_s27, %s1536_s1  ;;  %p960_p9 = scmp.lt.u32.totalorder %s958_s20, %s953_s23 }
  0x83   : > { %p956_p3 = pnand %p954_p13, %p925_p6  ;;  %p962_p1 = scmp.lt.u32.totalorder %s953_s23, %s1356_s27 }
  0x84   : > { %p961_p11 = por %p960_p9, %p959_p10 }
  0x85   : > { %p957_p7 = pneg %p956_p3 }
  0x86   : > { %p963_p4 = por %p962_p1, %p961_p11 }
  0x88   : > { %p964_p5 = pnand %p963_p4, %p957_p7 }
  0x8a   : > { %967 = shalt.err (!%p964_p5)
}
  0x8b   : > { %s968_s30 = scalar_lea.vmem %s309_s21, 128  ;;  %s1151_s19 = smov [#allocation5]  }
  0x8c   : > { %p969_p12 = scmp.ne.s32.totalorder %s309_s21, %s968_s30  ;;  %s973_s22 = sshll.u32 %s1151_s19, 4  ;;  %s974_s22 = int_to_ptr.vmem [resolvable:$false] %s973_s22 }
  0x8d   : > { %s975_s25 = scalar_lea.vmem %s974_s22, 256  ;;  %p976_p13 = scmp.lt.s32.totalorder %s309_s21, %s974_s22 }
  0x8e   : > { %p971_p0 = pnand %p969_p12, %p925_p6  ;;  %p977_p3 = scmp.lt.s32.totalorder %s975_s25, %s968_s30 }
  0x90   : > { %p972_p2 = pneg %p971_p0  ;;  %p978_p9 = por %p977_p3, %p976_p13 }
  0x92   : > { %p979_p10 = pnand %p978_p9, %p972_p2 }
  0x94   : > { %982 = shalt.err (!%p979_p10)
}
  0x95   : > { %768 = dma.hbm_to_vmem [thread:$0]  (!%p1349_p8), %s1356_s27, 128, %s309_s21, %s298_s18  }
  0x96   : > { %p1556_p7 = scmp.ne.s32.totalorder %s1550_s11, 0 }
  0x97   : > { %s319_s12 = sand.u32 (!%p1556_p7), 1, %s1137_s28   ;;  %p1557_p6 = scmp.ne.s32.totalorder (!%p1556_p7), %s1549_s10, 0 }
  0x98   : > { %317 = sbr.rel (%p1556_p7) target bundleno = 631 (0x277), region = 40  ;;  %s1409_s16 = sshll.u32 (!%p1556_p7), %s319_s12, 3 }
  0x99   : > { %s320_s2 = scalar_lea.sflag (!%p1556_p7), [#allocation3], %s319_s12  ;;  %s323_s23 = scalar_lea.vmem (!%p1556_p7), [#allocation2], %s1409_s16 }
  0x9f   : > { %1104 = dma.done.wait (%p1557_p6), %s320_s2, 128  }
  0xa0   : > { %1106 = vsyncadd (%p1557_p6), %s320_s2, 4294967168  ;;  %s328_s15 = sand.u32 1, %s1223_s9   ;;  %s332_s11 = scalar_lea.vmem [#allocation5], %s1409_s16 }
  0xa1   : > { %s329_s27 = scalar_lea.sflag [#allocation6], %s328_s15 }
  0xa2   : > { %1108 = dma.done.wait (%p1557_p6), %s329_s27, 128  }
  0xa3   : > { %1110 = vsyncadd (%p1557_p6), %s329_s27, 4294967168  ;;  %p1558_p8 = scmp.eq.s32.totalorder %s1223_s9, 0 }
  0xa5   : > { %1112 = dma.done.wait (%p1558_p8), [#allocation6], 16   ;;  %p1559_p11 = pmov %p1558_p8 }
  0xa6   : > { %p1560_p1 = pmov %p1558_p8 }
  0xa7   : > { %1114 = vsyncadd (%p1559_p11), [#allocation6], 4294967280 }
  0xa8   : > { %1116 = dma.done.wait (%p1560_p1), [#allocation9], 32   ;;  %p1561_p4 = pmov %p1560_p1 }
  0xa9   : > { %p1562_p5 = scmp.ne.s32.totalorder %s1223_s9, 0 }
  0xaa   : > { %1118 = vsyncadd (%p1561_p4), [#allocation9], 4294967264  ;;  %vm381_vm0 = vcmask (!%p1562_p5), 0   ;;  %v383_v0 = vld [vmem:[#allocation7] sm:$0x1] (!%p1562_p5)  ;;  %vm384_vm1 = vcmask (!%p1562_p5), 139264  }
  0xab   : > { %380 = sbr.rel (%p1562_p5) target bundleno = 178 (0xb2), region = 64  ;;  %v1152_v1 = vmov (!%p1562_p5), 0.0   ;;  %385 = vst.msk [vmem:[#allocation12] sm:$0x1] (!%p1562_p5), %vm384_vm1, %v383_v0  ;;  %v386_v2 = vld [vmem:[#allocation8] sm:$0x1] (!%p1562_p5) }
  0xac   : > { %382 = vst.msk [vmem:[#allocation11] sm:$0x1] (!%p1562_p5), %vm381_vm0, %v1152_v1 }
  0xad   : > { %387 = vst.msk [vmem:[#allocation14] sm:$0x1] (!%p1562_p5), %vm384_vm1, %v386_v2 }
  0xb2 PF: > { %v389_v3 = vld [vmem:[%s332_s11] sm:$0xff]  ;;  %v1153_v4 = vmov 0   ;;  %v406_v5 = vld [vmem:[#allocation10] sm:$0x1]  ;;  %v391_v19 = vlaneseq  ;;  %s703_s10 = sshll.u32 %s1223_s9, 3  ;;  %v1154_v41 = vmov 0.0  }
  0xb3   : > { %826 = vset.pattern.permute.xlu0 %v1153_v4  ;;  %v706_v6 = vadd.f32 -0.8, %v406_v5  ;;  %v388_v9 = vld [vmem:[%s323_s23] sm:$0xff]  ;;  %v393_v25 = vstv %s703_s10  ;;  %vm452_vm6 = vcmask 146432   ;;  %vm494_vm7 = vcmask 139264   ;;  %p707_p12 = scmp.ne.s32.totalorder %s1223_s9, 2 }
  0xb4   : > { %401 = vperm.xlu0 %826, %v389_v3   ;;  %v433_v10 = vand.u32 2147483647, %v388_v9  ;;  %v392_v21 = vshrl.u32 %v391_v19, 7  ;;  %v399_v32 = vand.u32 127, %v391_v19  ;;  %vm470_vm2 = vcmp.ge.f32.partialorder %v388_v9, 0.0 }
  0xb5   : > { %v408_v7 = vmul.f32 -12.0, %v706_v6  ;;  %v437_v37 = vmax.f32 %v388_v9, 0.0  ;;  %v492_v5 = vld [vmem:[#allocation12] sm:$0x1]  ;;  %v450_v19 = vld [vmem:[#allocation11] sm:$0x1] }
  0xb6   : > { %v434_v11 = vsub.f32 0.0, %v433_v10  ;;  %v421_v27 = vsub.s32 0, %v392_v21  ;;  %v394_v31 = vadd.s32 %v393_v25, %v392_v21  ;;  %vm465_vm8 = vcmask 0  }
  0xb7   : > { %v409_v8 = vmul.f32 1.442695, %v408_v7 }
  0xb8   : > { %v435_v12 = vmul.f32 1.442695, %v434_v11  ;;  %vm395_vm3 = vcmp.lt.s32.totalorder %v394_v31, 20 }
  0xb9   : > { %827 = vpow2.f32 %v409_v8  ;;  %v704_v46 = vsel %vm395_vm3, 1.0, %v1154_v41  ;;  %v496_v8 = vld [vmem:[#allocation14] sm:$0x1] }
  0xba   : > { %829 = vpow2.f32 %v435_v12 }
  0xc3   : > { %v828_v13 = vpop.eup %827 }
  0xc4   : > { %v411_v14 = vadd.f32 1.0, %v828_v13  ;;  %v830_v15 = vpop.eup %829 }
  0xc5   : > { %v440_v16 = vadd.f32 1.0, %v830_v15  ;;  %v443_v23 = vmul.f32 -0.5, %v830_v15  ;;  %v446_v33 = vand.u32 2147483647, %v830_v15 }
  0xc6   : > { %831 = vrcp.f32 %v411_v14 }
  0xc7   : > { %833 = vrcp.f32 %v440_v16  ;;  %v444_v29 = vadd.f32 1.0, %v443_v23  ;;  %vm447_vm5 = vcmp.lt.f32.partialorder %v446_v33, 0.0004427343 }
  0xc8   : > { %835 = vlog2.f32 %v440_v16 }
  0xc9   : > { %v445_v39 = vmul.f32 %v830_v15, %v444_v29 }
  0xd0   : > { %v832_v17 = vpop.eup %831 }
  0xd1   : > { %v414_v18 = vsub.f32 1.0, %v832_v17  ;;  %v834_v24 = vpop.eup %833  ;;  %v429_v40 = vrot.slane %v832_v17, %v421_v27 }
  0xd2   : > { %v471_v28 = vmul.f32 %v834_v24, %v830_v15  ;;  %v836_v30 = vpop.eup %835 }
  0xd3   : > { %v415_v20 = vmul.f32 4.0, %v414_v18  ;;  %v442_v38 = vmul.f32 0.6931472, %v836_v30 }
  0xd4   : > { %v472_v36 = vsel %vm470_vm2, %v834_v24, %v471_v28 }
  0xd5   : > { %v416_v22 = vadd.f32 1.0, %v415_v20  ;;  %v448_v47 = vsel %vm447_vm5, %v445_v39, %v442_v38 }
  0xd7   : > { %v417_v26 = vsub.f32 %v416_v22, %v832_v17 }
  0xd9   : > { %v422_v34 = vrot.slane %v417_v26, %v421_v27 }
 0x133   : > { %v402_v35 = vpop.permute.xlu0 %401 }
 0x134   : > { %vm403_vm4 = vcmp.eq.s32.totalorder %v399_v32, %v402_v35 }
 0x135   : > { %v705_v42 = vsel %vm403_vm4, 1.0, %v1154_v41 }
 0x136   : > { %v424_v43 = vmul.f32 %v705_v42, %v422_v34  ;;  %v438_v44 = vmul.f32 %v705_v42, %v388_v9  ;;  %v473_v45 = vsub.f32 %v472_v36, %v705_v42 }
 0x138   : > { %v431_v48 = vadd.f32 %v429_v40, %v424_v43  ;;  %v439_v49 = vsub.f32 %v437_v37, %v438_v44  ;;  %v474_v50 = vand.u32 2147483647, %v473_v45 }
 0x13a   : > { %v432_v51 = vmul.f32 %v704_v46, %v431_v48  ;;  %v449_v52 = vadd.f32 %v448_v47, %v439_v49 }
 0x13c   : > { %v451_v53 = vmul.f32 %v449_v52, %v432_v51  ;;  %v475_v54 = vmul.f32 %v474_v50, %v432_v51 }
 0x13e   : > { %v453_v55 = vsel %vm452_vm6, %v451_v53, 0.0  ;;  %v476_v56 = vmul.f32 %v705_v42, %v475_v54  ;;  %v484_v57 = vsel %vm452_vm6, %v475_v54, 0.0 }
 0x13f   : > { %v485_v58 = vrot.slane %v484_v57, 4  ;;  %454 = vadd.xlane.f32.xlu0 %v453_v55 }
 0x140   : > { %v477_v59 = vsel %vm452_vm6, %v476_v56, 0.0 }
 0x141   : > { %v478_v60 = vrot.slane %v477_v59, 4  ;;  %v486_v61 = vadd.f32 %v485_v58, %v484_v57 }
 0x143   : > { %v479_v62 = vadd.f32 %v478_v60, %v477_v59  ;;  %v487_v63 = vrot.slane %v486_v61, 2 }
 0x145   : > { %v480_v0 = vrot.slane %v479_v62, 2  ;;  %v488_v1 = vadd.f32 %v487_v63, %v486_v61 }
 0x147   : > { %v481_v2 = vadd.f32 %v480_v0, %v479_v62  ;;  %v489_v3 = vrot.slane %v488_v1, 1 }
 0x149   : > { %v482_v4 = vrot.slane %v481_v2, 1  ;;  %v490_v7 = vadd.f32 %v489_v3, %v488_v1 }
 0x14b   : > { %v483_v6 = vadd.f32 %v482_v4, %v481_v2 }
 0x14d   : > { %v491_v9 = vsub.f32 %v490_v7, %v483_v6  ;;  %v493_v10 = vadd.f32 %v492_v5, %v483_v6 }
 0x14f   : > { %495 = vst.msk [vmem:[#allocation12] sm:$0x1] %vm494_vm7, %v493_v10  ;;  %v497_v11 = vadd.f32 %v496_v8, %v491_v9 }
 0x151   : > { %498 = vst.msk [vmem:[#allocation14] sm:$0x1] %vm494_vm7, %v497_v11 }
 0x156   : > { %v507_v26 = vld [vmem:[#allocation12] sm:$0x1] (!%p707_p12) }
 0x158   : > { %v508_v23 = vld [vmem:[#allocation14] sm:$0x1] (!%p707_p12) }
 0x159   : > { %v509_v25 = vadd.f32 (!%p707_p12), 1e-10, %v508_v23 }
 0x15b   : > { %837 = vrcp.f32 (!%p707_p12), %v509_v25 }
 0x165   : > { %v838_v27 = vpop.eup (!%p707_p12), %837 }
 0x166   : > { %v511_v28 = vmul.f32 (!%p707_p12), %v838_v27, %v507_v26 }
 0x168   : > { %512 = vst.msk [vmem:[#allocation15] sm:$0x1] (!%p707_p12), %vm494_vm7, %v511_v28 }
 0x1cc   : > { %v455_v12 = vpop.xlane.xlu0 %454 }
 0x1cd   : > { %v456_v13 = vrot.slane %v455_v12, 4 }
 0x1cf   : > { %v457_v14 = vadd.f32 %v456_v13, %v455_v12 }
 0x1d1   : > { %v458_v15 = vrot.slane %v457_v14, 2 }
 0x1d3   : > { %v459_v16 = vadd.f32 %v458_v15, %v457_v14 }
 0x1d5   : > { %v460_v17 = vrot.slane %v459_v16, 1 }
 0x1d7   : > { %v461_v18 = vadd.f32 %v460_v17, %v459_v16 }
 0x1d9   : > { %718 = vpush %v461_v18 }
 0x208   : > { %502 = sbr.rel (%p707_p12) target bundleno = 537 (0x219), region = 68 }
 0x20a   : > { %s719_s21 = spop %718 }
 0x20b   : > { %v463_v20 = vstv %s719_s21 }
 0x20c   : > { %v464_v21 = vadd.f32 %v463_v20, %v450_v19 }
 0x20e   : > { %466 = vst.msk [vmem:[#allocation11] sm:$0x1] %vm465_vm8, %v464_v21 }
 0x215   : > { %v503_v22 = vld [vmem:[#allocation11] sm:$0x1] }
 0x216   : > { %v505_v24 = vmul.f32 0.05, %v503_v22 }
 0x218   : > { %506 = vst.msk [vmem:[#allocation11] sm:$0x1] %vm465_vm8, %v505_v24 }
 0x219 PF: > { %p776_p0 = scmp.eq.s32.totalorder %s1223_s9, 2  ;;  %s1155_s18 = smov [#allocation12]  }
 0x21a   : > { %s531_s26 = sshll.u32 %s1155_s18, 4  ;;  %s1156_s17 = smov [#allocation11]   ;;  %s532_s26 = int_to_ptr.vmem [resolvable:$true] %s531_s26 }
 0x21b   : > { %s520_s20 = sshll.u32 %s1156_s17, 4  ;;  %s983_s13 = scalar_lea.vmem %s532_s26, 16  ;;  %s521_s20 = int_to_ptr.vmem [resolvable:$true] %s520_s20 }
 0x21c   : > { %p984_p2 = scmp.ne.s32.totalorder %s532_s26, %s983_s13  ;;  %s989_s3 = scalar_lea.vmem %s532_s26, 32 }
 0x21d   : > { %p990_p9 = scmp.lt.s32.totalorder %s532_s26, %s532_s26  ;;  %p991_p10 = scmp.lt.s32.totalorder %s989_s3, %s983_s13 }
 0x21e   : > { %p985_p13 = pnand %p984_p2, %p776_p0 }
 0x21f   : > { %p992_p7 = por %p991_p10, %p990_p9 }
 0x220   : > { %p986_p3 = pneg %p985_p13 }
 0x222   : > { %p993_p6 = pnand %p992_p7, %p986_p3 }
 0x224   : > { %996 = shalt.err (!%p993_p6)
}
 0x225   : > { %s997_s22 = scalar_lea.hbm %s1541_s6, 16 }
 0x226   : > { %p998_p8 = scmp.ne.s32.totalorder %s1541_s6, %s997_s22  ;;  %p1003_p4 = scmp.lt.u32.totalorder %s997_s22, %s1541_s6 }
 0x228   : > { %p999_p11 = pnand %p998_p8, %p776_p0 }
 0x22a   : > { %p1000_p1 = pneg %p999_p11 }
 0x22c   : > { %p1005_p5 = pnand %p1003_p4, %p1000_p1 }
 0x22e   : > { %1008 = shalt.err (!%p1005_p5)
}
 0x22f   : > { %739 = dma.vmem_to_hbm [thread:$0]  (%p776_p0), %s532_s26, 16, %s1541_s6, [#allocation13]  }
 0x230   : > { %s1009_s27 = scalar_lea.vmem %s521_s20, 16  ;;  %s1015_s11 = scalar_lea.vmem %s521_s20, 32 }
 0x231   : > { %p1010_p12 = scmp.ne.s32.totalorder %s521_s20, %s1009_s27  ;;  %p1016_p3 = scmp.lt.s32.totalorder %s521_s20, %s521_s20 }
 0x232   : > { %p1017_p9 = scmp.lt.s32.totalorder %s1015_s11, %s1009_s27 }
 0x233   : > { %p1011_p2 = pnand %p1010_p12, %p776_p0 }
 0x234   : > { %p1018_p10 = por %p1017_p9, %p1016_p3 }
 0x235   : > { %p1012_p13 = pneg %p1011_p2 }
 0x237   : > { %p1019_p7 = pnand %p1018_p10, %p1012_p13 }
 0x239   : > { %1022 = shalt.err (!%p1019_p7)
}
 0x23a   : > { %s1023_s18 = scalar_lea.hbm %s1540_s5, 16 }
 0x23b   : > { %p1024_p6 = scmp.ne.s32.totalorder %s1540_s5, %s1023_s18  ;;  %p1029_p1 = scmp.lt.u32.totalorder %s1023_s18, %s1540_s5 }
 0x23d   : > { %p1025_p8 = pnand %p1024_p6, %p776_p0 }
 0x23f   : > { %p1026_p11 = pneg %p1025_p8 }
 0x241   : > { %p1031_p4 = pnand %p1029_p1, %p1026_p11 }
 0x243   : > { %1034 = shalt.err (!%p1031_p4)
}
 0x244   : > { %737 = dma.vmem_to_hbm [thread:$0]  (%p776_p0), %s521_s20, 16, %s1540_s5, [#allocation4]  }
 0x245   : > { %s1157_s22 = smov [#allocation14]   ;;  %s1158_s12 = smov [#allocation15]  }
 0x246   : > { %s542_s25 = sshll.u32 %s1157_s22, 4  ;;  %s553_s16 = sshll.u32 %s1158_s12, 4  ;;  %s543_s25 = int_to_ptr.vmem [resolvable:$true] %s542_s25  ;;  %s554_s16 = int_to_ptr.vmem [resolvable:$true] %s553_s16 }
 0x247   : > { %s1035_s2 = scalar_lea.vmem %s543_s25, 16  ;;  %s1041_s23 = scalar_lea.vmem %s543_s25, 32 }
 0x248   : > { %p1036_p5 = scmp.ne.s32.totalorder %s543_s25, %s1035_s2  ;;  %p1042_p13 = scmp.lt.s32.totalorder %s543_s25, %s543_s25 }
 0x249   : > { %p1043_p3 = scmp.lt.s32.totalorder %s1041_s23, %s1035_s2 }
 0x24a   : > { %p1037_p12 = pnand %p1036_p5, %p776_p0 }
 0x24b   : > { %p1044_p9 = por %p1043_p3, %p1042_p13 }
 0x24c   : > { %p1038_p2 = pneg %p1037_p12 }
 0x24e   : > { %p1045_p10 = pnand %p1044_p9, %p1038_p2 }
 0x250   : > { %1048 = shalt.err (!%p1045_p10)
}
 0x251   : > { %s1049_s20 = scalar_lea.hbm %s1542_s7, 16 }
 0x252   : > { %p1050_p7 = scmp.ne.s32.totalorder %s1542_s7, %s1049_s20  ;;  %p1055_p11 = scmp.lt.u32.totalorder %s1049_s20, %s1542_s7 }
 0x254   : > { %p1051_p6 = pnand %p1050_p7, %p776_p0 }
 0x256   : > { %p1052_p8 = pneg %p1051_p6 }
 0x258   : > { %p1057_p1 = pnand %p1055_p11, %p1052_p8 }
 0x25a   : > { %1060 = shalt.err (!%p1057_p1)
}
 0x25b   : > { %741 = dma.vmem_to_hbm [thread:$0]  (%p776_p0), %s543_s25, 16, %s1542_s7, [#allocation13]  }
 0x25c   : > { %s1061_s26 = scalar_lea.vmem %s554_s16, 16  ;;  %s1067_s3 = scalar_lea.vmem %s554_s16, 32 }
 0x25d   : > { %p1062_p4 = scmp.ne.s32.totalorder %s554_s16, %s1061_s26  ;;  %p1068_p2 = scmp.lt.s32.totalorder %s554_s16, %s554_s16 }
 0x25e   : > { %p1069_p13 = scmp.lt.s32.totalorder %s1067_s3, %s1061_s26 }
 0x25f   : > { %p1063_p5 = pnand %p1062_p4, %p776_p0 }
 0x260   : > { %p1070_p3 = por %p1069_p13, %p1068_p2 }
 0x261   : > { %p1064_p12 = pneg %p1063_p5 }
 0x263   : > { %p1071_p9 = pnand %p1070_p3, %p1064_p12 }
 0x265   : > { %1074 = shalt.err (!%p1071_p9)
}
 0x266   : > { %s1075_s22 = scalar_lea.hbm %s1543_s8, 16 }
 0x267   : > { %p1076_p10 = scmp.ne.s32.totalorder %s1543_s8, %s1075_s22  ;;  %p1081_p8 = scmp.lt.u32.totalorder %s1075_s22, %s1543_s8 }
 0x269   : > { %p1077_p7 = pnand %p1076_p10, %p776_p0 }
 0x26b   : > { %p1078_p6 = pneg %p1077_p7 }
 0x26d   : > { %p1083_p11 = pnand %p1081_p8, %p1078_p6 }
 0x26f   : > { %1086 = shalt.err (!%p1083_p11)
}
 0x270   : > { %743 = dma.vmem_to_hbm [thread:$0]  (%p776_p0), %s554_s16, 16, %s1543_s8, [#allocation16]  }
 0x271   : > { %1120 = dma.done.wait (%p776_p0), [#allocation4], 16  }
 0x272   : > { %1122 = vsyncadd (%p776_p0), [#allocation4], 4294967280 }
 0x273   : > { %1124 = dma.done.wait (%p776_p0), [#allocation13], 32  }
 0x274   : > { %1126 = vsyncadd (%p776_p0), [#allocation13], 4294967264 }
 0x275   : > { %1128 = dma.done.wait (%p776_p0), [#allocation16], 16  }
 0x276   : > { %1130 = vsyncadd (%p776_p0), [#allocation16], 4294967280 }
 0x277 PF: > { %p26_p1 = scmp.ge.s32.totalorder %s1325_s24, 5   ;;  %s1563_s27 = smov %s1137_s28 }
 0x278   : > { %s1564_s28 = smov %s1141_s29  ;;  %s1565_s29 = smov %s1335_s14 }
 0x279   : > { %s1566_s30 = smov %s1325_s24  ;;  %28 = sbr.rel (!%p26_p1) target bundleno = 12 (0xc), region = 134 }
 0x280   :  { %578 = vsyncpa [#allocation3], 1 }
 0x281   :  { %580 = vsyncpa [#allocation3 + $0x1], 1 }
 0x282   :  { %581 = vsyncpa [#allocation6], 1 }
 0x283   :  { %583 = vsyncpa [#allocation6 + $0x1], 1 }
 0x284   :  { %584 = vsyncpa [#allocation9], 1 }
 0x285   :  { %585 = vsyncpa [#allocation4], 1 }
 0x286   :  { %587 = vsyncpa [#allocation4 + $0x1], 1 }
 0x287   :  { %588 = vsyncpa [#allocation13], 1 }
 0x288   :  { %589 = vsyncpa [#allocation16], 1 }

</bundles_post_ra>
